<compile_context>
chip_gen: v5e
topology: v5e:2x2
jax: 0.10.0
libtpu: 0.0.40
codegen_flags: <defaults>
</compile_context>

<pallas_src>
import jax
import jax.numpy as jnp
from jax.experimental import pallas as pl
from jax.experimental.pallas import tpu as pltpu


# ---------------------------------------------------------------------------
# Parameter packing: all small weights/biases -> one (D, 65) f32 array.
# Everything is stored in its natural PyTorch (out, in) / (out, 1) layout so
# the kernel works in the transposed ("column") orientation with no extra
# transposes.  Row-deficient blocks (C < D rows) are zero-padded.
# ---------------------------------------------------------------------------
def pack_params(w1, b1, w2, b2, wfs, bfs, wff, bff, wct, bc):
    D, _ = w1.shape
    blocks, offs, col = [], {}, 0

    def add(name, arr):
        nonlocal col
        offs[name] = col
        r, c = arr.shape
        if r < D:
            arr = jnp.concatenate([arr, jnp.zeros((D - r, c), jnp.float32)],
                                  axis=0)
        blocks.append(arr.astype(jnp.float32))
        col += c

    add("w1", w1)            # (D, n_state)
    add("w2", w2)            # (D, D)
    add("b1", b1)            # (D, 1)
    add("b2", b2)            # (D, 1)
    add("wfs", wfs)          # (C, D)   FiLM scale projection
    add("wff", wff)          # (C, D)   FiLM shift projection
    add("wct", wct)          # (C, C)   1x1 conv weight (C_out, C_in)
    add("bfs1", bfs + 1.0)   # (C, 1)   FiLM "+1" folded into the scale bias
    add("bff", bff)          # (C, 1)
    add("bc", bc)            # (C, 1)   conv bias
    return jnp.concatenate(blocks, axis=1), offs


# ---------------------------------------------------------------------------
# Fully fused kernel (single grid step, 3 input DMAs, 1 output DMA).
#
#   ctxT   = SiLU(W2 @ SiLU(W1 @ clT + b1) + b2)              (D, B)
#   filmT  = ctxT * (1 + t/1000)                              (D, B)
#   scaleT = Wfs @ filmT + (bfs + 1)                          (C, B)
#   shiftT = Wff @ filmT + bff + bc * scaleT                  (C, B)
#   out    = BlockDiag_B(Wc) @ x_stacked * scale_col + shift_col   (B*C, HW)
# ---------------------------------------------------------------------------
def make_fused_kernel(B, C, D, n_state, offs):
    BC = B * C

    def kernel(ctT_ref, p_ref, xs_ref, out_ref):
        p = p_ref

        # --- unpack (static slices of the single packed operand) ----------
        clT = ctT_ref[0:n_state, :]                            # (n_state, B)
        trow = ctT_ref[n_state:n_state + 1, :]                 # (1, B)

        w1 = p[0:D, offs["w1"]:offs["w1"] + n_state]           # (D, n_state)
        w2 = p[0:D, offs["w2"]:offs["w2"] + D]                 # (D, D)
        b1 = p[0:D, offs["b1"]:offs["b1"] + 1]                 # (D, 1)
        b2 = p[0:D, offs["b2"]:offs["b2"] + 1]                 # (D, 1)
        wfs = p[0:C, offs["wfs"]:offs["wfs"] + D]              # (C, D)
        wff = p[0:C, offs["wff"]:offs["wff"] + D]              # (C, D)
        wct = p[0:C, offs["wct"]:offs["wct"] + C]              # (C, C)
        bfs1 = p[0:C, offs["bfs1"]:offs["bfs1"] + 1]           # (C, 1)
        bff = p[0:C, offs["bff"]:offs["bff"] + 1]              # (C, 1)
        bc = p[0:C, offs["bc"]:offs["bc"] + 1]                 # (C, 1)

        # --- StateEmbedding MLP (transposed layout, f32; tiny) -------------
        h = jnp.dot(w1, clT, preferred_element_type=jnp.float32) + b1
        h = h * jax.nn.sigmoid(h)                              # SiLU
        h = jnp.dot(w2, h, preferred_element_type=jnp.float32) + b2
        ctxT = h * jax.nn.sigmoid(h)                           # (D, B)

        # --- FiLM conditioning (stand-in timestep modulation) --------------
        filmT = ctxT * (1.0 + trow * (1.0 / 1000.0))           # (D, B)
        scaleT = jnp.dot(wfs, filmT,
                         preferred_element_type=jnp.float32) + bfs1   # (C, B)
        shiftT = (jnp.dot(wff, filmT,
                          preferred_element_type=jnp.float32)
                  + bff + bc * scaleT)                         # (C, B)

        # Stack per-(batch, channel) columns once, outside any loop.
        scale_col = jnp.concatenate(
            [scaleT[:, b:b + 1] for b in range(B)], axis=0)    # (BC, 1)
        shift_col = jnp.concatenate(
            [shiftT[:, b:b + 1] for b in range(B)], axis=0)    # (BC, 1)

        # --- Block-diagonal stacked 1x1 conv: ONE (BC,BC)@(BC,HW) matmul ----
        zero = jnp.zeros((C, C), jnp.float32)
        wbd = jnp.concatenate(
            [jnp.concatenate([wct if j == b else zero for j in range(B)],
                             axis=1)
             for b in range(B)], axis=0)                       # (BC, BC)

        hconv = jnp.dot(wbd, xs_ref[...],
                        preferred_element_type=jnp.float32)    # (BC, HW)

        # Single unmasked, lane-dense (BC, HW) store.
        out_ref[...] = hconv * scale_col + shift_col

    return kernel


def class_conditioned_unet_fwd(x_nchw, t, class_labels, packed, offs,
                               n_state, D):
    B, C, H, W = x_nchw.shape
    HW = H * W
    BC = B * C

    # Free, contiguous reinterpretations / tiny glue (a few dozen bytes).
    xs = x_nchw.reshape(BC, HW)                                 # (BC, HW)
    ctT = jnp.concatenate(
        [jnp.transpose(class_labels),
         t.astype(jnp.float32).reshape(1, B)], axis=0)          # (n_state+1, B)

    kernel = make_fused_kernel(B, C, D, n_state, offs)
    full2 = lambda i: (0, 0)

    out = pl.pallas_call(
        kernel,
        out_shape=jax.ShapeDtypeStruct((BC, HW), jnp.float32),
        grid=(1,),
        in_specs=[
            pl.BlockSpec((n_state + 1, B), full2),   # class labels + timestep
            pl.BlockSpec(tuple(packed.shape), full2),  # packed weights/biases
            pl.BlockSpec((BC, HW), full2),           # stacked activations
        ],
        out_specs=pl.BlockSpec((BC, HW), full2),
        compiler_params=pltpu.CompilerParams(
            dimension_semantics=("arbitrary",)),
    )(ctT, packed, xs)

    # Free reshape back to NCHW.
    return out.reshape(B, C, H, W)


# ---------------------------------------------------------------------------
# ClassConditionedUnet wrapper (params held as plain JAX arrays).
# ---------------------------------------------------------------------------
class ClassConditionedUnet:
    def __init__(self, context_size, n_channels, key):
        C = n_channels
        D = n_channels * 4
        self.time_embed_dim = D
        self.n_channels = C
        self.context_size = context_size

        k = jax.random.split(key, 6)
        s1 = 1.0 / jnp.sqrt(context_size)
        s2 = 1.0 / jnp.sqrt(D)
        # StateEmbedding params (PyTorch nn.Linear layout: (out, in) / (out, 1)).
        self.w1 = jax.random.uniform(k[0], (D, context_size), jnp.float32, -s1, s1)
        self.b1 = jax.random.uniform(k[1], (D, 1), jnp.float32, -s1, s1)
        self.w2 = jax.random.uniform(k[2], (D, D), jnp.float32, -s2, s2)
        self.b2 = jax.random.uniform(k[3], (D, 1), jnp.float32, -s2, s2)
        # Stand-in model params: 1x1 conv (C_out, C_in) + split FiLM projections.
        self.wct = jax.random.normal(k[4], (C, C), jnp.float32) * 0.1
        self.bc = jnp.zeros((C, 1), jnp.float32)
        wf = jax.random.normal(k[5], (D, 2 * C), jnp.float32) * 0.1
        self.wfs = jnp.transpose(wf[:, :C])   # (C, D) scale projection
        self.wff = jnp.transpose(wf[:, C:])   # (C, D) shift projection
        self.bfs = jnp.zeros((C, 1), jnp.float32)
        self.bff = jnp.zeros((C, 1), jnp.float32)

        # Pack all small weights/biases into ONE flat operand (1 DMA).
        self.packed, self.offs = pack_params(
            self.w1, self.b1, self.w2, self.b2,
            self.wfs, self.bfs, self.wff, self.bff, self.wct, self.bc)

    def __call__(self, x, t, class_labels=None, return_dict=False):
        sample = class_conditioned_unet_fwd(
            x, t, class_labels, self.packed, self.offs,
            self.context_size, self.time_embed_dim)
        if return_dict:
            return {"sample": sample}
        return (sample,)


# ---------------------------------------------------------------------------
# Pure-JAX reference (same math, no Pallas) for a correctness check.
# ---------------------------------------------------------------------------
def _reference(net, x, t, class_labels):
    h = class_labels @ net.w1.T + net.b1[:, 0]
    h = h * jax.nn.sigmoid(h)
    h = h @ net.w2.T + net.b2[:, 0]
    ctx = h * jax.nn.sigmoid(h)                                    # (B, D)
    film = ctx * (1.0 + t.astype(jnp.float32)[:, None] / 1000.0)   # (B, D)
    scale = film @ net.wfs.T + net.bfs[:, 0]                       # (B, C)
    shift = film @ net.wff.T + net.bff[:, 0]                       # (B, C)
    conv = jnp.einsum("oi,bihw->bohw", net.wct, x) \
        + net.bc[:, 0][None, :, None, None]
    return conv * (1.0 + scale)[:, :, None, None] \
        + shift[:, :, None, None]


if __name__ == "__main__":
    key = jax.random.PRNGKey(0)
    k_x, k_cl, k_param = jax.random.split(key, 3)

    B, C, H, W = 2, 4, 16, 16
    context_size = 8

    x = jax.random.normal(k_x, (B, C, H, W), jnp.float32)
    t = jnp.array([10, 500], dtype=jnp.int32)
    class_labels = jax.random.normal(k_cl, (B, context_size), jnp.float32)

    net = ClassConditionedUnet(context_size=context_size, n_channels=C,
                               key=k_param)
    out = net(x, t, class_labels=class_labels, return_dict=False)[0]
    out = jax.block_until_ready(out)
    assert out.shape == (B, C, H, W)

    ref = jax.block_until_ready(_reference(net, x, t, class_labels))
    assert jnp.allclose(out, ref, rtol=2e-3, atol=2e-3), (
        float(jnp.max(jnp.abs(out - ref))))

    print("KERNEL_OK")
</pallas_src>

<mosaic_0001>
module attributes {stable_mosaic.version = 11 : i64} {
  func.func @kernel(%arg0: i32, %arg1: memref<9x2xf32, #tpu.memory_space<vmem>>, %arg2: memref<16x65xf32, #tpu.memory_space<vmem>>, %arg3: memref<8x256xf32, #tpu.memory_space<vmem>>, %arg4: memref<8x256xf32, #tpu.memory_space<vmem>>) attributes {dimension_semantics = [#tpu.dimension_semantics<arbitrary>], iteration_bounds = array<i64: 1>, scalar_prefetch = 0 : i64, scratch_operands = 0 : i64, tpu.core_type = #tpu.core_type<tc>, window_params = [{pipeline_mode = #tpu.pipeline_mode<synchronous>, transform_indices = @transform_0, window_bounds = array<i64: 9, 2>}, {pipeline_mode = #tpu.pipeline_mode<synchronous>, transform_indices = @transform_1, window_bounds = array<i64: 16, 65>}, {pipeline_mode = #tpu.pipeline_mode<synchronous>, transform_indices = @transform_2, window_bounds = array<i64: 8, 256>}, {pipeline_mode = #tpu.pipeline_mode<synchronous>, transform_indices = @transform_3, window_bounds = array<i64: 8, 256>}]} {
    %c0 = arith.constant 0 : index
    %c0_0 = arith.constant 0 : index
    %0 = vector.load %arg1[%c0, %c0_0] : memref<9x2xf32, #tpu.memory_space<vmem>>, vector<8x2xf32>
    %c8 = arith.constant 8 : index
    %c0_1 = arith.constant 0 : index
    %1 = vector.load %arg1[%c8, %c0_1] : memref<9x2xf32, #tpu.memory_space<vmem>>, vector<1x2xf32>
    %c0_2 = arith.constant 0 : index
    %c0_3 = arith.constant 0 : index
    %2 = vector.load %arg2[%c0_2, %c0_3] : memref<16x65xf32, #tpu.memory_space<vmem>>, vector<16x8xf32>
    %c0_4 = arith.constant 0 : index
    %c8_5 = arith.constant 8 : index
    %3 = vector.load %arg2[%c0_4, %c8_5] : memref<16x65xf32, #tpu.memory_space<vmem>>, vector<16x16xf32>
    %c0_6 = arith.constant 0 : index
    %c24 = arith.constant 24 : index
    %4 = vector.load %arg2[%c0_6, %c24] : memref<16x65xf32, #tpu.memory_space<vmem>>, vector<16x1xf32>
    %c0_7 = arith.constant 0 : index
    %c25 = arith.constant 25 : index
    %5 = vector.load %arg2[%c0_7, %c25] : memref<16x65xf32, #tpu.memory_space<vmem>>, vector<16x1xf32>
    %c0_8 = arith.constant 0 : index
    %c26 = arith.constant 26 : index
    %6 = vector.load %arg2[%c0_8, %c26] : memref<16x65xf32, #tpu.memory_space<vmem>>, vector<4x16xf32>
    %c0_9 = arith.constant 0 : index
    %c42 = arith.constant 42 : index
    %7 = vector.load %arg2[%c0_9, %c42] : memref<16x65xf32, #tpu.memory_space<vmem>>, vector<4x16xf32>
    %c0_10 = arith.constant 0 : index
    %c58 = arith.constant 58 : index
    %8 = vector.load %arg2[%c0_10, %c58] : memref<16x65xf32, #tpu.memory_space<vmem>>, vector<4x4xf32>
    %c0_11 = arith.constant 0 : index
    %c62 = arith.constant 62 : index
    %9 = vector.load %arg2[%c0_11, %c62] : memref<16x65xf32, #tpu.memory_space<vmem>>, vector<4x1xf32>
    %c0_12 = arith.constant 0 : index
    %c63 = arith.constant 63 : index
    %10 = vector.load %arg2[%c0_12, %c63] : memref<16x65xf32, #tpu.memory_space<vmem>>, vector<4x1xf32>
    %c0_13 = arith.constant 0 : index
    %c64 = arith.constant 64 : index
    %11 = vector.load %arg2[%c0_13, %c64] : memref<16x65xf32, #tpu.memory_space<vmem>>, vector<4x1xf32>
    %cst = arith.constant dense<0.000000e+00> : vector<16x2xf32>
    %12 = tpu.matmul %2, %0, %cst {dimension_numbers = #tpu.dot_dimension_numbers<[1], [0], [0], [1], [0, 0, 1, 1], [], []>} : vector<16x8xf32>, vector<8x2xf32>, vector<16x2xf32> -> vector<16x2xf32>
    %13 = vector.broadcast %4 : vector<16x1xf32> to vector<16x2xf32>
    %14 = arith.addf %12, %13 : vector<16x2xf32>
    %15 = arith.negf %14 : vector<16x2xf32>
    %16 = math.exp %15 : vector<16x2xf32>
    %cst_14 = arith.constant 1.000000e+00 : f32
    %17 = vector.broadcast %cst_14 : f32 to vector<16x2xf32>
    %18 = arith.addf %17, %16 : vector<16x2xf32>
    %19 = arith.divf %17, %18 : vector<16x2xf32>
    %20 = arith.mulf %14, %19 : vector<16x2xf32>
    %cst_15 = arith.constant dense<0.000000e+00> : vector<16x2xf32>
    %21 = tpu.matmul %3, %20, %cst_15 {dimension_numbers = #tpu.dot_dimension_numbers<[1], [0], [0], [1], [0, 0, 1, 1], [], []>} : vector<16x16xf32>, vector<16x2xf32>, vector<16x2xf32> -> vector<16x2xf32>
    %22 = vector.broadcast %5 : vector<16x1xf32> to vector<16x2xf32>
    %23 = arith.addf %21, %22 : vector<16x2xf32>
    %24 = arith.negf %23 : vector<16x2xf32>
    %25 = math.exp %24 : vector<16x2xf32>
    %cst_16 = arith.constant 1.000000e+00 : f32
    %26 = vector.broadcast %cst_16 : f32 to vector<16x2xf32>
    %27 = arith.addf %26, %25 : vector<16x2xf32>
    %28 = arith.divf %26, %27 : vector<16x2xf32>
    %29 = arith.mulf %23, %28 : vector<16x2xf32>
    %cst_17 = arith.constant 1.000000e-03 : f32
    %30 = vector.broadcast %cst_17 : f32 to vector<1x2xf32>
    %31 = arith.mulf %1, %30 : vector<1x2xf32>
    %cst_18 = arith.constant 1.000000e+00 : f32
    %32 = vector.broadcast %cst_18 : f32 to vector<1x2xf32>
    %33 = arith.addf %32, %31 : vector<1x2xf32>
    %34 = vector.broadcast %33 : vector<1x2xf32> to vector<16x2xf32>
    %35 = arith.mulf %29, %34 : vector<16x2xf32>
    %cst_19 = arith.constant dense<0.000000e+00> : vector<4x2xf32>
    %36 = tpu.matmul %6, %35, %cst_19 {dimension_numbers = #tpu.dot_dimension_numbers<[1], [0], [0], [1], [0, 0, 1, 1], [], []>} : vector<4x16xf32>, vector<16x2xf32>, vector<4x2xf32> -> vector<4x2xf32>
    %37 = vector.broadcast %9 : vector<4x1xf32> to vector<4x2xf32>
    %38 = arith.addf %36, %37 : vector<4x2xf32>
    %cst_20 = arith.constant dense<0.000000e+00> : vector<4x2xf32>
    %39 = tpu.matmul %7, %35, %cst_20 {dimension_numbers = #tpu.dot_dimension_numbers<[1], [0], [0], [1], [0, 0, 1, 1], [], []>} : vector<4x16xf32>, vector<16x2xf32>, vector<4x2xf32> -> vector<4x2xf32>
    %40 = vector.broadcast %10 : vector<4x1xf32> to vector<4x2xf32>
    %41 = arith.addf %39, %40 : vector<4x2xf32>
    %42 = vector.broadcast %11 : vector<4x1xf32> to vector<4x2xf32>
    %43 = arith.mulf %42, %38 : vector<4x2xf32>
    %44 = arith.addf %41, %43 : vector<4x2xf32>
    %45 = vector.extract_strided_slice %38 {offsets = [0, 0], sizes = [4, 1], strides = [1, 1]} : vector<4x2xf32> to vector<4x1xf32>
    %46 = vector.extract_strided_slice %38 {offsets = [0, 1], sizes = [4, 1], strides = [1, 1]} : vector<4x2xf32> to vector<4x1xf32>
    %47 = tpu.concatenate %45, %46 in 0 : vector<4x1xf32>, vector<4x1xf32> -> vector<8x1xf32>
    %48 = vector.extract_strided_slice %44 {offsets = [0, 0], sizes = [4, 1], strides = [1, 1]} : vector<4x2xf32> to vector<4x1xf32>
    %49 = vector.extract_strided_slice %44 {offsets = [0, 1], sizes = [4, 1], strides = [1, 1]} : vector<4x2xf32> to vector<4x1xf32>
    %50 = tpu.concatenate %48, %49 in 0 : vector<4x1xf32>, vector<4x1xf32> -> vector<8x1xf32>
    %cst_21 = arith.constant 0.000000e+00 : f32
    %51 = vector.broadcast %cst_21 : f32 to vector<4x4xf32>
    %52 = tpu.concatenate %8, %51 in 1 : vector<4x4xf32>, vector<4x4xf32> -> vector<4x8xf32>
    %53 = tpu.concatenate %51, %8 in 1 : vector<4x4xf32>, vector<4x4xf32> -> vector<4x8xf32>
    %54 = tpu.concatenate %52, %53 in 0 : vector<4x8xf32>, vector<4x8xf32> -> vector<8x8xf32>
    %c0_22 = arith.constant 0 : index
    %c0_23 = arith.constant 0 : index
    %55 = vector.load %arg3[%c0_22, %c0_23] : memref<8x256xf32, #tpu.memory_space<vmem>>, vector<8x256xf32>
    %cst_24 = arith.constant dense<0.000000e+00> : vector<8x256xf32>
    %56 = tpu.matmul %54, %55, %cst_24 {dimension_numbers = #tpu.dot_dimension_numbers<[1], [0], [0], [1], [0, 0, 1, 1], [], []>} : vector<8x8xf32>, vector<8x256xf32>, vector<8x256xf32> -> vector<8x256xf32>
    %57 = vector.broadcast %47 : vector<8x1xf32> to vector<8x256xf32>
    %58 = arith.mulf %56, %57 : vector<8x256xf32>
    %59 = vector.broadcast %50 : vector<8x1xf32> to vector<8x256xf32>
    %60 = arith.addf %58, %59 : vector<8x256xf32>
    %c0_25 = arith.constant 0 : index
    %c0_26 = arith.constant 0 : index
    %61 = vector.load %arg4[%c0_25, %c0_26] : memref<8x256xf32, #tpu.memory_space<vmem>>, vector<8x256xf32>
    tpu.vector_store %arg4[%c0_25, %c0_26], %60 {strides = array<i32>} : memref<8x256xf32, #tpu.memory_space<vmem>>, vector<8x256xf32>,
    return
  }
  func.func @transform_0(%arg0: i32) -> (i32, i32) {
    %c0_i32 = arith.constant 0 : i32
    %c0_i32_0 = arith.constant 0 : i32
    %c0_i32_1 = arith.constant 0 : i32
    return %c0_i32, %c0_i32_0 : i32, i32
  }
  func.func @transform_1(%arg0: i32) -> (i32, i32) {
    %c0_i32 = arith.constant 0 : i32
    %c0_i32_0 = arith.constant 0 : i32
    %c0_i32_1 = arith.constant 0 : i32
    return %c0_i32, %c0_i32_0 : i32, i32
  }
  func.func @transform_2(%arg0: i32) -> (i32, i32) {
    %c0_i32 = arith.constant 0 : i32
    %c0_i32_0 = arith.constant 0 : i32
    %c0_i32_1 = arith.constant 0 : i32
    return %c0_i32, %c0_i32_0 : i32, i32
  }
  func.func @transform_3(%arg0: i32) -> (i32, i32) {
    %c0_i32 = arith.constant 0 : i32
    %c0_i32_0 = arith.constant 0 : i32
    %c0_i32_1 = arith.constant 0 : i32
    return %c0_i32, %c0_i32_0 : i32, i32
  }
}

</mosaic_0001>

<bundles_post_ra>
// kernel: tpu_custom_call.1
= control target key start
LH: loop header
LB: loop body
LE: loop exit
PB: predicated region body
PF: predicated region fallthrough
CT: control target
= control target key end

     0   :  { %8 = vsyncpa [#allocation3], 0  ;;  %s541_s0 = inlined_call_operand.vmem [shape: f32[9,2], index: 0, kind: input, shape index: {}]   ;;  %s542_s1 = inlined_call_operand.vmem [shape: f32[16,65], index: 1, kind: input, shape index: {}]   ;;  %s543_s2 = inlined_call_operand.hbm [shape: f32[8,256], index: 2, kind: input, shape index: {}]   ;;  %s544_s3 = inlined_call_operand.hbm [shape: f32[8,256], index: 3, kind: output, shape index: {}]  }
   0x1   :  { %9 = vsyncpa [#allocation4], 0  ;;  %s19_s14 = sshll.u32 %s543_s2, 4  ;;  %s466_s15 = smov [#allocation2]   ;;  %s20_s14 = int_to_ptr.hbm [resolvable:$true] %s19_s14 }
   0x2   :  { %s21_s16 = sshll.u32 %s466_s15, 4  ;;  %s22_s16 = int_to_ptr.vmem [resolvable:$true] %s21_s16 }
   0x3   :  { %24 = dma.hbm_to_vmem [thread:$0]  %s20_s14, 256, %s22_s16, [#allocation3]  }
   0x4   :  { %462 = dma.done.wait [#allocation3], 256  }
   0x5   :  { %463 = vsyncadd [#allocation3], 4294967040  ;;  %v467_v0 = vmov 24   ;;  %vm44_vm0 = vcmask 64512   ;;  %v29_v1 = vld [vmem:[%s541_s0] sm:$0xff]  ;;  %v32_v3 = vld [vmem:[%s542_s1 + $0x8] sm:$0xff] }
   0x6   :  { %390 = vset.pattern.permute.xlu0 %v467_v0  ;;  %v31_v2 = vld [vmem:[%s542_s1] sm:$0xff]  ;;  %64 = vmatpush.msra.mxu0 %v29_v1  ;;  %s468_s22 = smov 120   ;;  %v469_v19 = vmov 25   ;;  %s470_s25 = smov 102   ;;  %vm124_vm9 = vcmask 130048   ;;  %v474_v52 = vmov 62  }
   0x7   :  { %41 = vperm.xlu0 %390, %v32_v3   ;;  %364 = vmatmul.msk.f32.vlgmr.msra.gmra.mxu0 %vm44_vm0, %v31_v2  ;;  %v517_v17 = vld [vmem:[%s542_s1] sm:$0xf]  ;;  %s471_s26 = smov 86   ;;  %s472_s1 = smov 70   ;;  %v475_v53 = vmov 64   ;;  %v476_v54 = vmov 63  }
   0x8   :  { %120 = vrot.lane.b32.xlu1 %v31_v2, %s468_s22  ;;  %391 = vset.pattern.permute.xlu2 %v469_v19  ;;  %s473_s27 = smov 74   ;;  %v30_v62 = vld [vmem:[%s541_s0 + $0x8] sm:$0x1]  ;;  %s477_s0 = smov 127  }
   0x9   :  { %117 = vperm.xlu2 %391, %v32_v3   ;;  %392 = vset.pattern.permute.xlu1 %v474_v52  ;;  %s479_s30 = smov [#allocation5]   ;;  %s354_s7 = sshll.u32 %s544_s3, 4  ;;  %s355_s7 = int_to_ptr.hbm [resolvable:$true] %s354_s7 }
   0xa   :  { %s352_s4 = sshll.u32 %s479_s30, 4  ;;  %s353_s4 = int_to_ptr.vmem [resolvable:$true] %s352_s4 }
   0xf   :  { %36 = vperm.xlu0 %390, %v31_v2   ;;  %365 = vmatmul.msk.f32.gmra.mxu0 %vm44_vm0, %v32_v3 }
  0x10   :  { %122 = vrot.lane.b32.xlu1 %v32_v3, %s468_s22 }
  0x11   :  { %113 = vperm.xlu2 %391, %v31_v2  }
  0x17   :  { %202 = vrot.lane.b32.xlu0 %v517_v17, %s470_s25 }
  0x18   :  { %230 = vrot.lane.b32.xlu1 %v517_v17, %s471_s26  ;;  %394 = vset.pattern.permute.xlu0 %v475_v53 }
  0x19   :  { %278 = vrot.lane.b32.xlu2 %v517_v17, %s473_s27 }
  0x1a   :  { %393 = vset.pattern.permute.xlu2 %v476_v54 }
  0x1f   :  { %273 = vrot.lane.b32.xlu0 %v517_v17, %s472_s1 }
  0x20   :  { %199 = vperm.xlu1 %392, %v517_v17  }
  0x21   :  { %227 = vperm.xlu2 %393, %v517_v17  }
  0x27   :  { %255 = vperm.xlu0 %394, %v517_v17  }
  0x63   :  { %v118_v42 = vpop.permute.xlu2 %117 }
  0x6b   :  { %v114_v43 = vpop.permute.xlu2 %113 }
  0x79   :  { %v42_v4 = vpop.permute.xlu0 %41 }
  0x7a   :  { %v121_v39 = vpop.permute.xlu1 %120 }
  0x81   :  { %v37_v5 = vpop.permute.xlu0 %36 }
  0x82   :  { %v123_v41 = vpop.permute.xlu1 %122 }
  0x84   :  { %v66_v6 = vpop.f32.mrf.mxu0 }
  0x85   :  { %v67_v7 = vadd.f32 %v66_v6, %v37_v5 }
  0x87   :  { %v366_v8 = vmul.f32 -1.442695, %v67_v7 }
  0x89   :  { %398 = vpow2.f32 %v366_v8 }
  0x8c   :  { %v69_v9 = vpop.f32.mrf.mxu0 }
  0x8d   :  { %v70_v10 = vadd.f32 %v69_v9, %v42_v4  ;;  %v192_v4 = vmul.f32 0.001, %v30_v62 }
  0x8f   :  { %v399_v11 = vpop.eup %398  ;;  %v367_v12 = vmul.f32 -1.442695, %v70_v10 }
  0x90   :  { %v78_v13 = vadd.f32 1.0, %v399_v11  ;;  %v193_v11 = vadd.f32 1.0, %v192_v4 }
  0x91   :  { %400 = vpow2.f32 %v367_v12 }
  0x92   :  { %402 = vrcp.f32 %v78_v13  ;;  %vm85_vm2 = vweird.f32 %v78_v13  ;;  %v91_v27 = vand.u32 2147483648, %v78_v13  ;;  %v89_v30 = vand.u32 2147483647, %v78_v13 }
  0x94   :  { %v92_v34 = vor.u32 1.1754944e-38, %v91_v27  ;;  %vm90_vm8 = vcmp.eq.f32.partialorder %v89_v30, 8.507059e+37  ;;  %v287_v30 = vld [vmem:[#allocation2 + $0x8] sm:$0xff] }
  0x97   :  { %v401_v14 = vpop.eup %400 }
  0x98   :  { %v403_v15 = vpop.eup %402  ;;  %v79_v16 = vadd.f32 1.0, %v401_v14 }
  0x99   :  { %v81_v18 = vmul.f32 %v403_v15, %v78_v13  ;;  %vm86_vm1 = vweird.f32 %v403_v15 }
  0x9a   :  { %404 = vrcp.f32 %v79_v16  ;;  %v106_v26 = vand.u32 2147483648, %v79_v16  ;;  %v104_v29 = vand.u32 2147483647, %v79_v16  ;;  %vm87_vm4 = vmor %vm85_vm2, %vm86_vm1  ;;  %vm100_vm5 = vweird.f32 %v79_v16 }
  0x9b   :  { %v82_v20 = vsub.f32 1.0, %v81_v18  ;;  %v194_v18 = vperm.slane %v193_v11, 0 }
  0x9c   :  { %v107_v33 = vor.u32 1.1754944e-38, %v106_v26  ;;  %vm105_vm7 = vcmp.eq.f32.partialorder %v104_v29, 8.507059e+37  ;;  %v286_v29 = vld [vmem:[#allocation2] sm:$0xff] }
  0x9d   :  { %v83_v21 = vmul.f32 %v403_v15, %v82_v20  ;;  %v203_v20 = vpop.permute.xlu0 %202 }
  0x9f   :  { %v84_v25 = vadd.f32 %v403_v15, %v83_v21 }
  0xa0   :  { %v405_v22 = vpop.eup %404 }
  0xa1   :  { %v96_v23 = vmul.f32 %v405_v22, %v79_v16  ;;  %vm101_vm3 = vweird.f32 %v405_v22  ;;  %v88_v32 = vsel %vm87_vm4, %v403_v15, %v84_v25  ;;  %vm265_vm4 = vcmask 1043456  }
  0xa2   :  { %vm102_vm6 = vmor %vm100_vm5, %vm101_vm3  ;;  %v93_v37 = vsel %vm90_vm8, %v92_v34, %v88_v32  ;;  %vm276_vm3 = vcmask 31744  }
  0xa3   :  { %v97_v24 = vsub.f32 1.0, %v96_v23  ;;  %v110_v40 = vmul.f32 %v93_v37, %v67_v7  ;;  %v279_v23 = vpop.permute.xlu2 %278 }
  0xa5   :  { %v98_v28 = vmul.f32 %v405_v22, %v97_v24  ;;  %v281_v24 = vsel %vm276_vm3, 0.0, %v279_v23  ;;  %v274_v26 = vpop.permute.xlu0 %273 }
  0xa6   :  { %v283_v25 = vrot.slane %v281_v24, 4  ;;  %v277_v27 = vsel %vm276_vm3, %v274_v26, 0.0 }
  0xa7   :  { %v99_v31 = vadd.f32 %v405_v22, %v98_v28 }
  0xa8   :  { %v285_v28 = vsel %vm265_vm4, %v277_v27, %v283_v25 }
  0xa9   :  { %v103_v35 = vsel %vm102_vm6, %v405_v22, %v99_v31  ;;  %v231_v22 = vpop.permute.xlu1 %230 }
  0xaa   :  { %v108_v36 = vsel %vm105_vm7, %v107_v33, %v103_v35 }
  0xab   :  { %v111_v38 = vmul.f32 %v108_v36, %v70_v10  ;;  %v228_v32 = vpop.permute.xlu2 %227 }
  0xad   :  { %143 = vmatpush.msra.mxu1 %v111_v38  ;;  %v256_v33 = vpop.permute.xlu0 %255 }
  0xaf   :  { %144 = vmatpush.msra.mxu1 %v110_v40 }
  0xb0   :  { %368 = vmatmul.msk.f32.vlgmr.msra.gmra.mxu1 %vm124_vm9, %v121_v39 }
  0xb1   :  { %v200_v31 = vpop.permute.xlu1 %199 }
  0xb8   :  { %369 = vmatmul.msk.f32.gmra.mxu1 %vm124_vm9, %v123_v41 }
 0x12d   :  { %v146_v44 = vpop.f32.mrf.mxu1 }
 0x12e   :  { %v147_v45 = vadd.f32 %v146_v44, %v114_v43 }
 0x130   :  { %v370_v46 = vmul.f32 -1.442695, %v147_v45 }
 0x132   :  { %406 = vpow2.f32 %v370_v46 }
 0x135   :  { %v149_v47 = vpop.f32.mrf.mxu1 }
 0x136   :  { %v150_v48 = vadd.f32 %v149_v47, %v118_v42  ;;  %v478_v42 = vmov 0  }
 0x137   :  { %396 = vset.pattern.permute.xlu2 %v478_v42  ;;  %395 = vset.pattern.permute.xlu1 %v478_v42 }
 0x138   :  { %v407_v49 = vpop.eup %406  ;;  %v371_v50 = vmul.f32 -1.442695, %v150_v48  ;;  %397 = vset.pattern.permute.xlu0 %v478_v42 }
 0x139   :  { %v158_v51 = vadd.f32 1.0, %v407_v49 }
 0x13a   :  { %408 = vpow2.f32 %v371_v50 }
 0x13b   :  { %410 = vrcp.f32 %v158_v51  ;;  %v171_v1 = vand.u32 2147483648, %v158_v51  ;;  %vm165_vm11 = vweird.f32 %v158_v51  ;;  %v169_v2 = vand.u32 2147483647, %v158_v51 }
 0x13d   :  { %v172_v9 = vor.u32 1.1754944e-38, %v171_v1  ;;  %vm170_vm14 = vcmp.eq.f32.partialorder %v169_v2, 8.507059e+37 }
 0x140   :  { %v409_v55 = vpop.eup %408 }
 0x141   :  { %v411_v56 = vpop.eup %410  ;;  %v159_v57 = vadd.f32 1.0, %v409_v55 }
 0x142   :  { %v161_v58 = vmul.f32 %v411_v56, %v158_v51  ;;  %vm166_vm10 = vweird.f32 %v411_v56 }
 0x143   :  { %412 = vrcp.f32 %v159_v57  ;;  %vm167_vm12 = vmor %vm165_vm11, %vm166_vm10  ;;  %v186_v5 = vand.u32 2147483648, %v159_v57  ;;  %v184_v8 = vand.u32 2147483647, %v159_v57  ;;  %vm180_vm15 = vweird.f32 %v159_v57 }
 0x144   :  { %v162_v59 = vsub.f32 1.0, %v161_v58 }
 0x145   :  { %v187_v13 = vor.u32 1.1754944e-38, %v186_v5  ;;  %vm185_vm2 = vcmp.eq.f32.partialorder %v184_v8, 8.507059e+37 }
 0x146   :  { %v163_v60 = vmul.f32 %v411_v56, %v162_v59 }
 0x148   :  { %v164_v63 = vadd.f32 %v411_v56, %v163_v60 }
 0x149   :  { %v413_v61 = vpop.eup %412 }
 0x14a   :  { %v176_v0 = vmul.f32 %v413_v61, %v159_v57  ;;  %v168_v6 = vsel %vm167_vm12, %v411_v56, %v164_v63  ;;  %vm181_vm13 = vweird.f32 %v413_v61 }
 0x14b   :  { %v173_v12 = vsel %vm170_vm14, %v172_v9, %v168_v6  ;;  %vm182_vm1 = vmor %vm180_vm15, %vm181_vm13 }
 0x14c   :  { %v177_v3 = vsub.f32 1.0, %v176_v0  ;;  %v190_v16 = vmul.f32 %v173_v12, %v147_v45 }
 0x14e   :  { %v178_v7 = vmul.f32 %v413_v61, %v177_v3  ;;  %v195_v21 = vmul.f32 %v194_v18, %v190_v16 }
 0x150   :  { %v179_v10 = vadd.f32 %v413_v61, %v178_v7 }
 0x152   :  { %v183_v14 = vsel %vm182_vm1, %v413_v61, %v179_v10 }
 0x153   :  { %v188_v15 = vsel %vm185_vm2, %v187_v13, %v183_v14 }
 0x154   :  { %v191_v17 = vmul.f32 %v188_v15, %v150_v48 }
 0x156   :  { %v196_v19 = vmul.f32 %v194_v18, %v191_v17 }
 0x158   :  { %220 = vmatpush.msra.mxu2 %v196_v19  ;;  %248 = vmatpush.msra.mxu3 %v196_v19 }
 0x15a   :  { %221 = vmatpush.msra.mxu2 %v195_v21  ;;  %249 = vmatpush.msra.mxu3 %v195_v21 }
 0x15b   :  { %372 = vmatmul.msk.f32.vlgmr.msra.gmra.mxu2 %vm124_vm9, %v203_v20  ;;  %373 = vmatmul.msk.f32.vlgmr.msra.gmra.mxu3 %vm124_vm9, %v231_v22 }
 0x15c   :  { %306 = vmatpush.msrb.mxu2 %v286_v29  ;;  %326 = vmatpush.msrb.mxu3 %v287_v30 }
 0x163   :  { %374 = vmatmul.msk.f32.vlgmr.msrb.gmra.mxu2 %vm44_vm0, %v285_v28  ;;  %375 = vmatmul.msk.f32.vlgmr.msrb.gmra.mxu3 %vm44_vm0, %v285_v28 }
 0x1de   :  { %v223_v34 = vpop.f32.mrf.mxu2  ;;  %v251_v35 = vpop.f32.mrf.mxu3 }
 0x1df   :  { %v224_v36 = vadd.f32 %v223_v34, %v200_v31  ;;  %v252_v37 = vadd.f32 %v251_v35, %v228_v32 }
 0x1e1   :  { %v258_v38 = vmul.f32 %v256_v33, %v224_v36  ;;  %v261_v39 = vrot.slane %v224_v36, 4 }
 0x1e3   :  { %v259_v40 = vadd.f32 %v258_v38, %v252_v37  ;;  %262 = vrot.lane.b32.xlu1 %v261_v39, %s477_s0 }
 0x1e5   :  { %v268_v41 = vrot.slane %v259_v40, 4 }
 0x1e6   :  { %v308_v47 = vpop.f32.mrf.mxu2  ;;  %v328_v48 = vpop.f32.mrf.mxu3 }
 0x1e7   :  { %269 = vrot.lane.b32.xlu2 %v268_v41, %s477_s0 }
 0x241   :  { %v270_v43 = vpop.permute.xlu2 %269 }
 0x242   :  { %v272_v44 = vsel %vm265_vm4, %v259_v40, %v270_v43 }
 0x243   :  { %340 = vperm.xlu2 %396, %v272_v44  }
 0x255   :  { %v263_v45 = vpop.permute.xlu1 %262 }
 0x256   :  { %v266_v46 = vsel %vm265_vm4, %v224_v36, %v263_v45 }
 0x257   :  { %333 = vperm.xlu1 %395, %v266_v46  }
 0x29d   :  { %v341_v52 = vpop.permute.xlu2 %340 }
 0x2c9   :  { %v334_v49 = vpop.permute.xlu1 %333 }
 0x2ca   :  { %v336_v50 = vmul.f32 %v334_v49, %v308_v47  ;;  %v337_v51 = vmul.f32 %v334_v49, %v328_v48 }
 0x2cc   :  { %v343_v53 = vadd.f32 %v341_v52, %v336_v50  ;;  %v344_v54 = vadd.f32 %v341_v52, %v337_v51 }
 0x2ce   :  { %345 = vst [vmem:[#allocation5] sm:$0xff] %v343_v53 }
 0x2cf   :  { %346 = vst [vmem:[#allocation5 + $0x8] sm:$0xff] %v344_v54 }
 0x2d0   :  { %357 = dma.vmem_to_hbm [thread:$0]  %s353_s4, 256, %s355_s7, [#allocation4]  }
 0x2d1   :  { %464 = dma.done.wait [#allocation4], 256  }
 0x2d2   :  { %465 = vsyncadd [#allocation4], 4294967040 }
 0x2d3   :  { %362 = vsyncpa [#allocation3], 1 }
 0x2d4   :  { %363 = vsyncpa [#allocation4], 1 }

</bundles_post_ra>
